<compile_context>
chip_gen: v7x
topology: tpu7x:2x2x1
jax: 0.10.0
libtpu: 0.0.40
codegen_flags: <defaults>
</compile_context>

<pallas_src>
import functools

import jax
import jax.numpy as jnp
from jax.experimental import pallas as pl
from jax.experimental.pallas import tpu as pltpu

N_EMBD = 64
NUM_HEADS = 4
HEAD_SIZE = N_EMBD // NUM_HEADS   # 16
BLOCK_SIZE = 32                   # max sequence length in the PyTorch module

_NEG_INF = -1e30                  # finite "minus infinity": robust if a row were ever fully masked


def _mha_kernel(x_ref, wqkv_ref, wp_ref, bp_ref, o_ref, *,
                num_heads, head_size, batch_block, seq_len):
    C = num_heads * head_size
    Bb, T = batch_block, seq_len
    M = Bb * T

    cdt = wqkv_ref.dtype   # MXU operand dtype chosen by the wrapper (f32 or bf16)

    # ---- fused Q/K/V projection on the flattened (Bb*T, C) slab -----------------------
    x2 = x_ref[...].reshape(M, C).astype(cdt)              # leading-dim merge: layout-free
    qkv = jnp.dot(x2, wqkv_ref[...],
                  preferred_element_type=jnp.float32)      # (M, 3C), f32 accumulation
    qkv3 = qkv.reshape(Bb, T, 3 * C)                        # leading-dim split: layout-free

    # ---- causal additive mask, built once and broadcast once --------------------------
    row = jax.lax.broadcasted_iota(jnp.int32, (T, T), 0)
    col = jax.lax.broadcasted_iota(jnp.int32, (T, T), 1)
    addend = jnp.where(col <= row, 0.0, _NEG_INF).astype(jnp.float32)
    addend = jnp.broadcast_to(addend[None, :, :], (Bb, T, T))

    # NOTE: the PyTorch module scales by n_embd**-0.5 (NOT head_size**-0.5).
    # This is intentional to match the reference; do not "fix" silently.
    scale = float(C) ** -0.5

    wp_all = wp_ref[...]                                    # (C, C), loaded once
    bias = bp_ref[...]                                      # (1, C), f32

    acc = None
    for h in range(num_heads):                              # static unroll, H = 4
        lo = h * head_size
        qh = qkv3[:, :, lo:lo + head_size].astype(cdt)                  # (Bb, T, hs)
        kh = qkv3[:, :, C + lo:C + lo + head_size].astype(cdt)
        vh = qkv3[:, :, 2 * C + lo:2 * C + lo + head_size].astype(cdt)

        # Scores: contract on the head dim of both operands (no explicit transpose).
        s = jax.lax.dot_general(qh, kh, (((2,), (2,)), ((0,), (0,))),
                                preferred_element_type=jnp.float32)     # (Bb, T, T)
        s = s * scale + addend

        # Softmax in f32.
        m = jnp.max(s, axis=-1, keepdims=True)
        p = jnp.exp(s - m)
        p = p * pl.reciprocal(jnp.sum(p, axis=-1, keepdims=True), approx=False)

        o_h = jax.lax.dot_general(p.astype(cdt), vh,
                                  (((2,), (1,)), ((0,), (0,))),
                                  preferred_element_type=jnp.float32)   # (Bb, T, hs)

        # Output projection distributed over heads (replaces the lane-axis concat):
        #   cat @ Wp == sum_h O_h @ Wp[h*hs:(h+1)*hs, :]
        contrib = jnp.dot(o_h.reshape(M, head_size).astype(cdt),
                          wp_all[lo:lo + head_size, :],
                          preferred_element_type=jnp.float32)           # (M, C)
        acc = contrib if acc is None else acc + contrib

    out = acc + bias                                        # (M, C) + (1, C) broadcast
    o_ref[...] = out.reshape(Bb, T, C).astype(o_ref.dtype)  # leading-dim split: layout-free


def multi_head_attention(x, wq, wk, wv, wp, bp, *, batch_block=None, compute_dtype=None):
    """x: (B, T, C); wq/wk/wv/wp: (C, C) pre-transposed (heads stacked column-wise); bp: (1, C).

    compute_dtype: set to jnp.bfloat16 on v5e/v6e/v7x for ~2x MXU throughput and half the
    DMA bytes (accumulation and softmax stay f32). Default None keeps exact f32 math.
    """
    B, T, C = x.shape
    assert C == NUM_HEADS * HEAD_SIZE
    assert T <= BLOCK_SIZE

    # Fuse the three projection weights into one (C, 3C) matmul operand.
    w_qkv = jnp.concatenate([wq, wk, wv], axis=1)

    out_dtype = x.dtype
    if compute_dtype is not None:
        x = x.astype(compute_dtype)
        w_qkv = w_qkv.astype(compute_dtype)
        wp = wp.astype(compute_dtype)
    bp = bp.astype(jnp.float32)

    # Fold Bb batch elements into each grid step so M = Bb*T approaches a multiple of the
    # MXU height (128 on v5e, 256 on v6e/v7x); Bb must divide B.
    if batch_block is None:
        bb = max(1, min(B, 256 // max(T, 1)))
        while B % bb:
            bb -= 1
    else:
        bb = batch_block
        assert B % bb == 0
    grid = (B // bb,)

    kernel = functools.partial(_mha_kernel, num_heads=NUM_HEADS, head_size=HEAD_SIZE,
                               batch_block=bb, seq_len=T)

    return pl.pallas_call(
        kernel,
        out_shape=jax.ShapeDtypeStruct((B, T, C), out_dtype),
        grid_spec=pltpu.PrefetchScalarGridSpec(
            num_scalar_prefetch=0,
            grid=grid,
            in_specs=[
                pl.BlockSpec((bb, T, C), lambda g: (g, 0, 0)),   # x, Bb batch rows per step
                pl.BlockSpec((C, 3 * C), lambda g: (0, 0)),      # fused [Wq | Wk | Wv]
                pl.BlockSpec((C, C), lambda g: (0, 0)),          # projection weight
                pl.BlockSpec((1, C), lambda g: (0, 0)),          # projection bias (f32)
            ],
            out_specs=pl.BlockSpec((bb, T, C), lambda g: (g, 0, 0)),
        ),
        compiler_params=pltpu.CompilerParams(
            # Batch blocks are independent -> megacore/parallel sharding (2 TCs on v7x).
            dimension_semantics=("parallel",)),
    )(x, w_qkv, wp, bp)


def _reference(x, wq, wk, wv, wp, bp):
    """Pure-JAX reference mirroring the PyTorch module (eval mode)."""
    B, T, C = x.shape
    q = x @ wq
    k = x @ wk
    v = x @ wv
    q = q.reshape(B, T, NUM_HEADS, HEAD_SIZE).transpose(0, 2, 1, 3)
    k = k.reshape(B, T, NUM_HEADS, HEAD_SIZE).transpose(0, 2, 1, 3)
    v = v.reshape(B, T, NUM_HEADS, HEAD_SIZE).transpose(0, 2, 1, 3)
    s = jnp.einsum("bhqd,bhkd->bhqk", q, k) * (C ** -0.5)
    mask = jnp.tril(jnp.ones((T, T), dtype=bool))
    s = jnp.where(mask, s, -jnp.inf)
    p = jax.nn.softmax(s, axis=-1)
    o = jnp.einsum("bhqk,bhkd->bhqd", p, v)
    o = o.transpose(0, 2, 1, 3).reshape(B, T, C)
    return o @ wp + bp


if __name__ == "__main__":
    key = jax.random.PRNGKey(0)
    kx, kq, kk, kv, kp, kb = jax.random.split(key, 6)

    B, T, C = 2, 8, N_EMBD   # T <= block_size (32)

    x = jax.random.normal(kx, (B, T, C), dtype=jnp.float32)

    # Deterministic synthetic parameters. Each per-head Linear (head_size, n_embd) is
    # stored pre-transposed and stacked column-wise into a (C, C) matrix.
    wq = 0.05 * jax.random.normal(kq, (C, C), dtype=jnp.float32)
    wk = 0.05 * jax.random.normal(kk, (C, C), dtype=jnp.float32)
    wv = 0.05 * jax.random.normal(kv, (C, C), dtype=jnp.float32)
    wp = 0.05 * jax.random.normal(kp, (C, C), dtype=jnp.float32)   # proj weight (pre-transposed)
    bp = 0.05 * jax.random.normal(kb, (1, C), dtype=jnp.float32)   # proj bias

    out = jax.block_until_ready(multi_head_attention(x, wq, wk, wv, wp, bp))
    ref = _reference(x, wq, wk, wv, wp, bp)
    assert out.shape == (B, T, C)
    assert jnp.allclose(out, ref, atol=1e-5, rtol=1e-5), "mismatch vs reference (small)"

    # Exercise the multi-block grid path: B=8, T=32, Bb=4 -> grid=(2,), M=128 rows/step.
    B2, T2 = 8, BLOCK_SIZE
    x_big = jax.random.normal(jax.random.fold_in(kx, 1), (B2, T2, C), dtype=jnp.float32)
    out_big = jax.block_until_ready(
        multi_head_attention(x_big, wq, wk, wv, wp, bp, batch_block=4))
    ref_big = _reference(x_big, wq, wk, wv, wp, bp)
    assert out_big.shape == (B2, T2, C)
    assert jnp.allclose(out_big, ref_big, atol=1e-4, rtol=1e-4), "mismatch vs reference (large)"

    print("KERNEL_OK")
</pallas_src>

<mosaic_0001>
module attributes {stable_mosaic.version = 11 : i64} {
  func.func @_mha_kernel(%arg0: i32, %arg1: memref<2x8x64xf32, #tpu.memory_space<vmem>>, %arg2: memref<64x192xf32, #tpu.memory_space<vmem>>, %arg3: memref<64x64xf32, #tpu.memory_space<vmem>>, %arg4: memref<1x64xf32, #tpu.memory_space<vmem>>, %arg5: memref<2x8x64xf32, #tpu.memory_space<vmem>>) attributes {dimension_semantics = [#tpu.dimension_semantics<parallel>], iteration_bounds = array<i64: 1>, scalar_prefetch = 0 : i64, scratch_operands = 0 : i64, tpu.core_type = #tpu.core_type<tc>, window_params = [{transform_indices = @transform_0, window_bounds = array<i64: 2, 8, 64>}, {pipeline_mode = #tpu.pipeline_mode<synchronous>, transform_indices = @transform_1, window_bounds = array<i64: 64, 192>}, {pipeline_mode = #tpu.pipeline_mode<synchronous>, transform_indices = @transform_2, window_bounds = array<i64: 64, 64>}, {pipeline_mode = #tpu.pipeline_mode<synchronous>, transform_indices = @transform_3, window_bounds = array<i64: 1, 64>}, {transform_indices = @transform_4, window_bounds = array<i64: 2, 8, 64>}]} {
    %c0 = arith.constant 0 : index
    %c0_0 = arith.constant 0 : index
    %c0_1 = arith.constant 0 : index
    %0 = vector.load %arg1[%c0, %c0_0, %c0_1] : memref<2x8x64xf32, #tpu.memory_space<vmem>>, vector<2x8x64xf32>
    %1 = vector.shape_cast %0 : vector<2x8x64xf32> to vector<16x64xf32>
    %c0_2 = arith.constant 0 : index
    %c0_3 = arith.constant 0 : index
    %2 = vector.load %arg2[%c0_2, %c0_3] : memref<64x192xf32, #tpu.memory_space<vmem>>, vector<64x192xf32>
    %cst = arith.constant dense<0.000000e+00> : vector<16x192xf32>
    %3 = tpu.matmul %1, %2, %cst {dimension_numbers = #tpu.dot_dimension_numbers<[1], [0], [0], [1], [0, 0, 1, 1], [], []>} : vector<16x64xf32>, vector<64x192xf32>, vector<16x192xf32> -> vector<16x192xf32>
    %4 = vector.shape_cast %3 : vector<16x192xf32> to vector<2x8x192xf32>
    %5 = tpu.iota {dimensions = array<i32: 0>} : vector<8x8xi32>
    %6 = tpu.iota {dimensions = array<i32: 1>} : vector<8x8xi32>
    %7 = arith.cmpi sle, %6, %5 : vector<8x8xi32>
    %cst_4 = arith.constant 0.000000e+00 : f32
    %cst_5 = arith.constant -1.000000e+30 : f32
    %8 = vector.broadcast %cst_4 : f32 to vector<8x8xf32>
    %9 = vector.broadcast %cst_5 : f32 to vector<8x8xf32>
    %10 = arith.select %7, %8, %9 : vector<8x8xi1>, vector<8x8xf32>
    %11 = vector.shape_cast %10 : vector<8x8xf32> to vector<1x8x8xf32>
    %12 = vector.shape_cast %11 : vector<1x8x8xf32> to vector<1x8x8xf32>
    %13 = vector.broadcast %12 : vector<1x8x8xf32> to vector<2x8x8xf32>
    %c0_6 = arith.constant 0 : index
    %c0_7 = arith.constant 0 : index
    %14 = vector.load %arg3[%c0_6, %c0_7] : memref<64x64xf32, #tpu.memory_space<vmem>>, vector<64x64xf32>
    %c0_8 = arith.constant 0 : index
    %c0_9 = arith.constant 0 : index
    %15 = vector.load %arg4[%c0_8, %c0_9] : memref<1x64xf32, #tpu.memory_space<vmem>>, vector<1x64xf32>
    %16 = vector.extract_strided_slice %4 {offsets = [0, 0, 0], sizes = [2, 8, 16], strides = [1, 1, 1]} : vector<2x8x192xf32> to vector<2x8x16xf32>
    %17 = vector.extract_strided_slice %4 {offsets = [0, 0, 64], sizes = [2, 8, 16], strides = [1, 1, 1]} : vector<2x8x192xf32> to vector<2x8x16xf32>
    %18 = vector.extract_strided_slice %4 {offsets = [0, 0, 128], sizes = [2, 8, 16], strides = [1, 1, 1]} : vector<2x8x192xf32> to vector<2x8x16xf32>
    %cst_10 = arith.constant dense<0.000000e+00> : vector<2x8x8xf32>
    %19 = tpu.matmul %16, %17, %cst_10 {dimension_numbers = #tpu.dot_dimension_numbers<[2], [2], [1], [1], [0, 0, 0, 1, 1, 1], [0], [0]>} : vector<2x8x16xf32>, vector<2x8x16xf32>, vector<2x8x8xf32> -> vector<2x8x8xf32>
    %cst_11 = arith.constant 1.250000e-01 : f32
    %20 = vector.broadcast %cst_11 : f32 to vector<2x8x8xf32>
    %21 = arith.mulf %19, %20 : vector<2x8x8xf32>
    %22 = arith.addf %21, %13 : vector<2x8x8xf32>
    %cst_12 = arith.constant dense<0xFF800000> : vector<2x8xf32>
    %23 = vector.multi_reduction <maximumf>, %22, %cst_12 [2] : vector<2x8x8xf32> to vector<2x8xf32>
    %24 = vector.shape_cast %23 : vector<2x8xf32> to vector<2x8x1xf32>
    %25 = vector.broadcast %24 : vector<2x8x1xf32> to vector<2x8x8xf32>
    %26 = arith.subf %22, %25 : vector<2x8x8xf32>
    %27 = math.exp %26 : vector<2x8x8xf32>
    %cst_13 = arith.constant dense<0.000000e+00> : vector<2x8xf32>
    %28 = vector.multi_reduction <add>, %27, %cst_13 [2] : vector<2x8x8xf32> to vector<2x8xf32>
    %29 = vector.shape_cast %28 : vector<2x8xf32> to vector<2x8x1xf32>
    %30 = tpu.reciprocal %29 : vector<2x8x1xf32> -> vector<2x8x1xf32>
    %31 = vector.broadcast %30 : vector<2x8x1xf32> to vector<2x8x8xf32>
    %32 = arith.mulf %27, %31 : vector<2x8x8xf32>
    %cst_14 = arith.constant dense<0.000000e+00> : vector<2x8x16xf32>
    %33 = tpu.matmul %32, %18, %cst_14 {dimension_numbers = #tpu.dot_dimension_numbers<[2], [1], [1], [2], [0, 0, 0, 1, 1, 2], [0], [0]>} : vector<2x8x8xf32>, vector<2x8x16xf32>, vector<2x8x16xf32> -> vector<2x8x16xf32>
    %34 = vector.shape_cast %33 : vector<2x8x16xf32> to vector<16x16xf32>
    %35 = vector.extract_strided_slice %14 {offsets = [0, 0], sizes = [16, 64], strides = [1, 1]} : vector<64x64xf32> to vector<16x64xf32>
    %cst_15 = arith.constant dense<0.000000e+00> : vector<16x64xf32>
    %36 = tpu.matmul %34, %35, %cst_15 {dimension_numbers = #tpu.dot_dimension_numbers<[1], [0], [0], [1], [0, 0, 1, 1], [], []>} : vector<16x16xf32>, vector<16x64xf32>, vector<16x64xf32> -> vector<16x64xf32>
    %37 = vector.extract_strided_slice %4 {offsets = [0, 0, 16], sizes = [2, 8, 16], strides = [1, 1, 1]} : vector<2x8x192xf32> to vector<2x8x16xf32>
    %38 = vector.extract_strided_slice %4 {offsets = [0, 0, 80], sizes = [2, 8, 16], strides = [1, 1, 1]} : vector<2x8x192xf32> to vector<2x8x16xf32>
    %39 = vector.extract_strided_slice %4 {offsets = [0, 0, 144], sizes = [2, 8, 16], strides = [1, 1, 1]} : vector<2x8x192xf32> to vector<2x8x16xf32>
    %cst_16 = arith.constant dense<0.000000e+00> : vector<2x8x8xf32>
    %40 = tpu.matmul %37, %38, %cst_16 {dimension_numbers = #tpu.dot_dimension_numbers<[2], [2], [1], [1], [0, 0, 0, 1, 1, 1], [0], [0]>} : vector<2x8x16xf32>, vector<2x8x16xf32>, vector<2x8x8xf32> -> vector<2x8x8xf32>
    %cst_17 = arith.constant 1.250000e-01 : f32
    %41 = vector.broadcast %cst_17 : f32 to vector<2x8x8xf32>
    %42 = arith.mulf %40, %41 : vector<2x8x8xf32>
    %43 = arith.addf %42, %13 : vector<2x8x8xf32>
    %cst_18 = arith.constant dense<0xFF800000> : vector<2x8xf32>
    %44 = vector.multi_reduction <maximumf>, %43, %cst_18 [2] : vector<2x8x8xf32> to vector<2x8xf32>
    %45 = vector.shape_cast %44 : vector<2x8xf32> to vector<2x8x1xf32>
    %46 = vector.broadcast %45 : vector<2x8x1xf32> to vector<2x8x8xf32>
    %47 = arith.subf %43, %46 : vector<2x8x8xf32>
    %48 = math.exp %47 : vector<2x8x8xf32>
    %cst_19 = arith.constant dense<0.000000e+00> : vector<2x8xf32>
    %49 = vector.multi_reduction <add>, %48, %cst_19 [2] : vector<2x8x8xf32> to vector<2x8xf32>
    %50 = vector.shape_cast %49 : vector<2x8xf32> to vector<2x8x1xf32>
    %51 = tpu.reciprocal %50 : vector<2x8x1xf32> -> vector<2x8x1xf32>
    %52 = vector.broadcast %51 : vector<2x8x1xf32> to vector<2x8x8xf32>
    %53 = arith.mulf %48, %52 : vector<2x8x8xf32>
    %cst_20 = arith.constant dense<0.000000e+00> : vector<2x8x16xf32>
    %54 = tpu.matmul %53, %39, %cst_20 {dimension_numbers = #tpu.dot_dimension_numbers<[2], [1], [1], [2], [0, 0, 0, 1, 1, 2], [0], [0]>} : vector<2x8x8xf32>, vector<2x8x16xf32>, vector<2x8x16xf32> -> vector<2x8x16xf32>
    %55 = vector.shape_cast %54 : vector<2x8x16xf32> to vector<16x16xf32>
    %56 = vector.extract_strided_slice %14 {offsets = [16, 0], sizes = [16, 64], strides = [1, 1]} : vector<64x64xf32> to vector<16x64xf32>
    %cst_21 = arith.constant dense<0.000000e+00> : vector<16x64xf32>
    %57 = tpu.matmul %55, %56, %cst_21 {dimension_numbers = #tpu.dot_dimension_numbers<[1], [0], [0], [1], [0, 0, 1, 1], [], []>} : vector<16x16xf32>, vector<16x64xf32>, vector<16x64xf32> -> vector<16x64xf32>
    %58 = arith.addf %36, %57 : vector<16x64xf32>
    %59 = vector.extract_strided_slice %4 {offsets = [0, 0, 32], sizes = [2, 8, 16], strides = [1, 1, 1]} : vector<2x8x192xf32> to vector<2x8x16xf32>
    %60 = vector.extract_strided_slice %4 {offsets = [0, 0, 96], sizes = [2, 8, 16], strides = [1, 1, 1]} : vector<2x8x192xf32> to vector<2x8x16xf32>
    %61 = vector.extract_strided_slice %4 {offsets = [0, 0, 160], sizes = [2, 8, 16], strides = [1, 1, 1]} : vector<2x8x192xf32> to vector<2x8x16xf32>
    %cst_22 = arith.constant dense<0.000000e+00> : vector<2x8x8xf32>
    %62 = tpu.matmul %59, %60, %cst_22 {dimension_numbers = #tpu.dot_dimension_numbers<[2], [2], [1], [1], [0, 0, 0, 1, 1, 1], [0], [0]>} : vector<2x8x16xf32>, vector<2x8x16xf32>, vector<2x8x8xf32> -> vector<2x8x8xf32>
    %cst_23 = arith.constant 1.250000e-01 : f32
    %63 = vector.broadcast %cst_23 : f32 to vector<2x8x8xf32>
    %64 = arith.mulf %62, %63 : vector<2x8x8xf32>
    %65 = arith.addf %64, %13 : vector<2x8x8xf32>
    %cst_24 = arith.constant dense<0xFF800000> : vector<2x8xf32>
    %66 = vector.multi_reduction <maximumf>, %65, %cst_24 [2] : vector<2x8x8xf32> to vector<2x8xf32>
    %67 = vector.shape_cast %66 : vector<2x8xf32> to vector<2x8x1xf32>
    %68 = vector.broadcast %67 : vector<2x8x1xf32> to vector<2x8x8xf32>
    %69 = arith.subf %65, %68 : vector<2x8x8xf32>
    %70 = math.exp %69 : vector<2x8x8xf32>
    %cst_25 = arith.constant dense<0.000000e+00> : vector<2x8xf32>
    %71 = vector.multi_reduction <add>, %70, %cst_25 [2] : vector<2x8x8xf32> to vector<2x8xf32>
    %72 = vector.shape_cast %71 : vector<2x8xf32> to vector<2x8x1xf32>
    %73 = tpu.reciprocal %72 : vector<2x8x1xf32> -> vector<2x8x1xf32>
    %74 = vector.broadcast %73 : vector<2x8x1xf32> to vector<2x8x8xf32>
    %75 = arith.mulf %70, %74 : vector<2x8x8xf32>
    %cst_26 = arith.constant dense<0.000000e+00> : vector<2x8x16xf32>
    %76 = tpu.matmul %75, %61, %cst_26 {dimension_numbers = #tpu.dot_dimension_numbers<[2], [1], [1], [2], [0, 0, 0, 1, 1, 2], [0], [0]>} : vector<2x8x8xf32>, vector<2x8x16xf32>, vector<2x8x16xf32> -> vector<2x8x16xf32>
    %77 = vector.shape_cast %76 : vector<2x8x16xf32> to vector<16x16xf32>
    %78 = vector.extract_strided_slice %14 {offsets = [32, 0], sizes = [16, 64], strides = [1, 1]} : vector<64x64xf32> to vector<16x64xf32>
    %cst_27 = arith.constant dense<0.000000e+00> : vector<16x64xf32>
    %79 = tpu.matmul %77, %78, %cst_27 {dimension_numbers = #tpu.dot_dimension_numbers<[1], [0], [0], [1], [0, 0, 1, 1], [], []>} : vector<16x16xf32>, vector<16x64xf32>, vector<16x64xf32> -> vector<16x64xf32>
    %80 = arith.addf %58, %79 : vector<16x64xf32>
    %81 = vector.extract_strided_slice %4 {offsets = [0, 0, 48], sizes = [2, 8, 16], strides = [1, 1, 1]} : vector<2x8x192xf32> to vector<2x8x16xf32>
    %82 = vector.extract_strided_slice %4 {offsets = [0, 0, 112], sizes = [2, 8, 16], strides = [1, 1, 1]} : vector<2x8x192xf32> to vector<2x8x16xf32>
    %83 = vector.extract_strided_slice %4 {offsets = [0, 0, 176], sizes = [2, 8, 16], strides = [1, 1, 1]} : vector<2x8x192xf32> to vector<2x8x16xf32>
    %cst_28 = arith.constant dense<0.000000e+00> : vector<2x8x8xf32>
    %84 = tpu.matmul %81, %82, %cst_28 {dimension_numbers = #tpu.dot_dimension_numbers<[2], [2], [1], [1], [0, 0, 0, 1, 1, 1], [0], [0]>} : vector<2x8x16xf32>, vector<2x8x16xf32>, vector<2x8x8xf32> -> vector<2x8x8xf32>
    %cst_29 = arith.constant 1.250000e-01 : f32
    %85 = vector.broadcast %cst_29 : f32 to vector<2x8x8xf32>
    %86 = arith.mulf %84, %85 : vector<2x8x8xf32>
    %87 = arith.addf %86, %13 : vector<2x8x8xf32>
    %cst_30 = arith.constant dense<0xFF800000> : vector<2x8xf32>
    %88 = vector.multi_reduction <maximumf>, %87, %cst_30 [2] : vector<2x8x8xf32> to vector<2x8xf32>
    %89 = vector.shape_cast %88 : vector<2x8xf32> to vector<2x8x1xf32>
    %90 = vector.broadcast %89 : vector<2x8x1xf32> to vector<2x8x8xf32>
    %91 = arith.subf %87, %90 : vector<2x8x8xf32>
    %92 = math.exp %91 : vector<2x8x8xf32>
    %cst_31 = arith.constant dense<0.000000e+00> : vector<2x8xf32>
    %93 = vector.multi_reduction <add>, %92, %cst_31 [2] : vector<2x8x8xf32> to vector<2x8xf32>
    %94 = vector.shape_cast %93 : vector<2x8xf32> to vector<2x8x1xf32>
    %95 = tpu.reciprocal %94 : vector<2x8x1xf32> -> vector<2x8x1xf32>
    %96 = vector.broadcast %95 : vector<2x8x1xf32> to vector<2x8x8xf32>
    %97 = arith.mulf %92, %96 : vector<2x8x8xf32>
    %cst_32 = arith.constant dense<0.000000e+00> : vector<2x8x16xf32>
    %98 = tpu.matmul %97, %83, %cst_32 {dimension_numbers = #tpu.dot_dimension_numbers<[2], [1], [1], [2], [0, 0, 0, 1, 1, 2], [0], [0]>} : vector<2x8x8xf32>, vector<2x8x16xf32>, vector<2x8x16xf32> -> vector<2x8x16xf32>
    %99 = vector.shape_cast %98 : vector<2x8x16xf32> to vector<16x16xf32>
    %100 = vector.extract_strided_slice %14 {offsets = [48, 0], sizes = [16, 64], strides = [1, 1]} : vector<64x64xf32> to vector<16x64xf32>
    %cst_33 = arith.constant dense<0.000000e+00> : vector<16x64xf32>
    %101 = tpu.matmul %99, %100, %cst_33 {dimension_numbers = #tpu.dot_dimension_numbers<[1], [0], [0], [1], [0, 0, 1, 1], [], []>} : vector<16x16xf32>, vector<16x64xf32>, vector<16x64xf32> -> vector<16x64xf32>
    %102 = arith.addf %80, %101 : vector<16x64xf32>
    %103 = vector.broadcast %15 : vector<1x64xf32> to vector<16x64xf32>
    %104 = arith.addf %102, %103 : vector<16x64xf32>
    %105 = vector.shape_cast %104 : vector<16x64xf32> to vector<2x8x64xf32>
    %c0_34 = arith.constant 0 : index
    %c0_35 = arith.constant 0 : index
    %c0_36 = arith.constant 0 : index
    %106 = vector.load %arg5[%c0_34, %c0_35, %c0_36] : memref<2x8x64xf32, #tpu.memory_space<vmem>>, vector<2x8x64xf32>
    tpu.vector_store %arg5[%c0_34, %c0_35, %c0_36], %105 {strides = array<i32>} : memref<2x8x64xf32, #tpu.memory_space<vmem>>, vector<2x8x64xf32>,
    return
  }
  func.func @transform_0(%arg0: i32) -> (i32, i32, i32) {
    %c0_i32 = arith.constant 0 : i32
    %c0_i32_0 = arith.constant 0 : i32
    %c0_i32_1 = arith.constant 0 : i32
    return %arg0, %c0_i32, %c0_i32_0 : i32, i32, i32
  }
  func.func @transform_1(%arg0: i32) -> (i32, i32) {
    %c0_i32 = arith.constant 0 : i32
    %c0_i32_0 = arith.constant 0 : i32
    %c0_i32_1 = arith.constant 0 : i32
    return %c0_i32, %c0_i32_0 : i32, i32
  }
  func.func @transform_2(%arg0: i32) -> (i32, i32) {
    %c0_i32 = arith.constant 0 : i32
    %c0_i32_0 = arith.constant 0 : i32
    %c0_i32_1 = arith.constant 0 : i32
    return %c0_i32, %c0_i32_0 : i32, i32
  }
  func.func @transform_3(%arg0: i32) -> (i32, i32) {
    %c0_i32 = arith.constant 0 : i32
    %c0_i32_0 = arith.constant 0 : i32
    %c0_i32_1 = arith.constant 0 : i32
    return %c0_i32, %c0_i32_0 : i32, i32
  }
  func.func @transform_4(%arg0: i32) -> (i32, i32, i32) {
    %c0_i32 = arith.constant 0 : i32
    %c0_i32_0 = arith.constant 0 : i32
    %c0_i32_1 = arith.constant 0 : i32
    return %arg0, %c0_i32, %c0_i32_0 : i32, i32, i32
  }
}

</mosaic_0001>

<bundles_post_ra>
// kernel: tpu_custom_call.1
= control target key start
LH: loop header
LB: loop body
LE: loop exit
PB: predicated region body
PF: predicated region fallthrough
CT: control target
= control target key end

     0   :  { %9 = vsyncpa [#allocation3], 0  ;;  %s2508_s0 = inlined_call_operand.hbm [shape: f32[2,8,64], index: 0, kind: input, shape index: {}]   ;;  %s2509_s1 = inlined_call_operand.hbm [shape: f32[64,192], index: 1, kind: input, shape index: {}]   ;;  %s2510_s2 = inlined_call_operand.hbm [shape: f32[64,64], index: 2, kind: input, shape index: {}]   ;;  %s2511_s3 = inlined_call_operand.vmem [shape: f32[1,64], index: 3, kind: input, shape index: {}]   ;;  %s2512_s4 = inlined_call_operand.hbm [shape: f32[2,8,64], index: 4, kind: output, shape index: {}]  }
   0x1   :  { %10 = vsyncpa [#allocation6], 0 }
   0x2   :  { %11 = vsyncpa [#allocation4], 0  ;;  %s2236_s15 = smov [#allocation5]   ;;  %s2142_s19 = scalar_lea.hbm %s2509_s1, 2048 }
   0x3   :  { %s29_s16 = sshll.u32 %s2236_s15, 4  ;;  %p2143_p0 = scmp.ne.s32.totalorder %s2509_s1, %s2142_s19  ;;  %s30_s16 = int_to_ptr.vmem [resolvable:$true] %s29_s16 }
   0x4   :  { %p2146_p1 = scmp.lt.u32.totalorder %s2142_s19, %s2509_s1 }
   0x6   :  { %p2148_p2 = pnand %p2146_p1, %p2143_p0 }
   0x8   :  { %2151 = shalt.err (!%p2148_p2)
}
   0x9   :  { %s2152_s24 = scalar_lea.vmem %s30_s16, 2048  ;;  %p2157_p4 = scmp.lt.s32.totalorder %s30_s16, %s30_s16 }
   0xa   :  { %p2153_p3 = scmp.ne.s32.totalorder %s30_s16, %s2152_s24  ;;  %p2158_p5 = scmp.lt.s32.totalorder %s2152_s24, %s2152_s24 }
   0xc   :  { %p2159_p6 = por %p2158_p5, %p2157_p4 }
   0xe   :  { %p2160_p7 = pnand %p2159_p6, %p2153_p3 }
  0x10   :  { %2163 = shalt.err (!%p2160_p7)
}
  0x11   :  { %s2237_s25 = smov 256   ;;  %s2238_s26 = smov 16  }
  0x12   :  { %35 = dma.hbm_to_vmem [thread:$0]  %s2509_s1, 2048, %s30_s16, [#allocation6], %s2237_s25, %s2237_s25, %s2238_s26  }
  0x13   :  { %s2239_s29 = smov [#allocation2]   ;;  %s2164_s7 = scalar_lea.hbm %s2508_s0, 256 }
  0x14   :  { %s17_s30 = sshll.u32 %s2239_s29, 4  ;;  %p2165_p8 = scmp.ne.s32.totalorder %s2508_s0, %s2164_s7  ;;  %s18_s30 = int_to_ptr.vmem [resolvable:$true] %s17_s30 }
  0x15   :  { %p2168_p9 = scmp.lt.u32.totalorder %s2164_s7, %s2508_s0 }
  0x17   :  { %p2170_p10 = pnand %p2168_p9, %p2165_p8 }
  0x19   :  { %2173 = shalt.err (!%p2170_p10)
}
  0x1a   :  { %s2174_s12 = scalar_lea.vmem %s18_s30, 256  ;;  %p2179_p12 = scmp.lt.s32.totalorder %s18_s30, %s18_s30 }
  0x1b   :  { %p2175_p11 = scmp.ne.s32.totalorder %s18_s30, %s2174_s12  ;;  %p2180_p13 = scmp.lt.s32.totalorder %s2174_s12, %s2174_s12 }
  0x1d   :  { %p2181_p0 = por %p2180_p13, %p2179_p12 }
  0x1f   :  { %p2182_p1 = pnand %p2181_p0, %p2175_p11 }
  0x21   :  { %2185 = shalt.err (!%p2182_p1)
}
  0x22   :  { %s2240_s1 = smov 128   ;;  %s2241_s13 = smov 8  }
  0x23   :  { %23 = dma.hbm_to_vmem [thread:$0]  %s2508_s0, 256, %s18_s30, [#allocation3], %s2240_s1, %s2240_s1, %s2241_s13  }
  0x24   :  { %s2242_s16 = smov [#allocation7]   ;;  %s2186_s20 = scalar_lea.hbm %s2510_s2, 1024 }
  0x25   :  { %s41_s17 = sshll.u32 %s2242_s16, 4  ;;  %p2187_p2 = scmp.ne.s32.totalorder %s2510_s2, %s2186_s20  ;;  %s42_s17 = int_to_ptr.vmem [resolvable:$true] %s41_s17 }
  0x26   :  { %p2190_p3 = scmp.lt.u32.totalorder %s2186_s20, %s2510_s2 }
  0x28   :  { %p2192_p4 = pnand %p2190_p3, %p2187_p2 }
  0x2a   :  { %2195 = shalt.err (!%p2192_p4)
}
  0x2b   :  { %s2196_s25 = scalar_lea.vmem %s42_s17, 1024  ;;  %p2201_p6 = scmp.lt.s32.totalorder %s42_s17, %s42_s17 }
  0x2c   :  { %p2197_p5 = scmp.ne.s32.totalorder %s42_s17, %s2196_s25  ;;  %p2202_p7 = scmp.lt.s32.totalorder %s2196_s25, %s2196_s25 }
  0x2e   :  { %p2203_p8 = por %p2202_p7, %p2201_p6 }
  0x30   :  { %p2204_p9 = pnand %p2203_p8, %p2197_p5 }
  0x32   :  { %2207 = shalt.err (!%p2204_p9)
}
  0x33   :  { %47 = dma.hbm_to_vmem [thread:$0]  %s2510_s2, 1024, %s42_s17, [#allocation6], %s2240_s1, %s2240_s1, %s2241_s13  }
  0x34   :  { %2230 = dma.done.wait [#allocation3], 256  }
  0x35   :  { %2231 = vsyncadd [#allocation3], 4294967040 }
  0x36   :  { %2232 = dma.done.wait [#allocation6], 3072  }
  0x37   :  { %2233 = vsyncadd [#allocation6], 4294964224  ;;  %v2243_v0 = vmov 0.0   ;;  %v62_v1 = vld [vmem:[#allocation5 + $0x8] sm:$0xff]  ;;  %v64_v2 = vld [vmem:[#allocation5 + $0x18] sm:$0xff]  ;;  %vm77_vm0 = vcmask 523264   ;;  %v161_v35 = vlaneseq }
  0x38   :  { %148 = vmatprep.mubr.f32.mxu0 %v2243_v0  ;;  %1947 = vmatprep.subr.mxu1 %v2243_v0  ;;  %v61_v3 = vld [vmem:[#allocation5] sm:$0xff]  ;;  %v2055_v4 = vpack.c.bf16 %v64_v2, %v62_v1  ;;  %v63_v5 = vld [vmem:[#allocation5 + $0x10] sm:$0xff]  ;;  %v66_v6 = vld [vmem:[#allocation5 + $0x28] sm:$0xff]  ;;  %vm2244_vm1 = vmmov 0   ;;  %s2245_s2 = smov 64   ;;  %s2246_s28 = smov 48  }
  0x39   :  { %v68_v7 = vld [vmem:[#allocation5 + $0x38] sm:$0xff]  ;;  %v2057_v8 = vpack.c.bf16 %v63_v5, %v61_v3  ;;  %v65_v10 = vld [vmem:[#allocation5 + $0x20] sm:$0xff]  ;;  %v67_v11 = vld [vmem:[#allocation5 + $0x30] sm:$0xff]  ;;  %1949 = vmatprep.mubr.msk.f32.mxu1 %vm2244_vm1, %v2243_v0  ;;  %s2247_s29 = smov 112   ;;  %vm179_vm2 = vcmask 130048   ;;  %v162_v36 = vshrl.u32 %v161_v35, 7 }
  0x3a   :  { %v2059_v9 = vpack.c.bf16 %v68_v7, %v66_v6  ;;  %v70_v12 = vld [vmem:[#allocation5 + $0x48] sm:$0xff]  ;;  %2056 = vmatprep.subr.bf16.mxu0 %v2055_v4  ;;  %v72_v13 = vld [vmem:[#allocation5 + $0x58] sm:$0xff]  ;;  %v2061_v14 = vpack.c.bf16 %v67_v11, %v65_v10  ;;  %v69_v16 = vld [vmem:[#allocation5 + $0x40] sm:$0xff]  ;;  %v164_v37 = vand.u32 127, %v161_v35  ;;  %v2248_v39 = vmov -1e+30  }
  0x3b   :  { %2058 = vmatpush1.bf16.msra.mxu0 %v2057_v8  ;;  %v2063_v15 = vpack.c.bf16 %v72_v13, %v70_v12  ;;  %v71_v17 = vld [vmem:[#allocation5 + $0x50] sm:$0xff]  ;;  %v74_v18 = vld [vmem:[#allocation5 + $0x68] sm:$0xff]  ;;  %v76_v19 = vld [vmem:[#allocation5 + $0x78] sm:$0xff]  ;;  %vm335_vm4 = vcmask 64512   ;;  %s2249_s30 = smov 96   ;;  %s2250_s5 = smov 32  }
  0x3c   :  { %2060 = vmatprep.subr.bf16.mxu0 %v2059_v9  ;;  %v2065_v20 = vpack.c.bf16 %v71_v17, %v69_v16  ;;  %v2067_v21 = vpack.c.bf16 %v76_v19, %v74_v18  ;;  %v73_v22 = vld [vmem:[#allocation5 + $0x60] sm:$0xff]  ;;  %v75_v23 = vld [vmem:[#allocation5 + $0x70] sm:$0xff]  ;;  %v60_v26 = vld [vmem:[#allocation2 + $0x8] sm:$0xff]  ;;  %vm165_vm3 = vcmp.le.s32.totalorder %v164_v37, %v162_v36  ;;  %s2251_s6 = smov 80   ;;  %s2252_s8 = smov [#allocation8]  }
  0x3d   :  { %v2069_v24 = vpack.c.bf16 %v75_v23, %v73_v22  ;;  %v59_v25 = vld [vmem:[#allocation2] sm:$0xff]  ;;  %v2364_v40 = vsel %vm165_vm3, 0.0, %v2248_v39  ;;  %s1851_s9 = sshll.u32 %s2252_s8, 4  ;;  %s1852_s9 = int_to_ptr.vmem [resolvable:$true] %s1851_s9 }
  0x3e   :  { %s2208_s10 = scalar_lea.vmem %s1852_s9, 256  ;;  %p2213_p11 = scmp.lt.s32.totalorder %s1852_s9, %s1852_s9 }
  0x3f   :  { %2062 = vmatpush1.bf16.msra.mxu0 %v2061_v14  ;;  %p2209_p10 = scmp.ne.s32.totalorder %s1852_s9, %s2208_s10  ;;  %p2214_p12 = scmp.lt.s32.totalorder %s2208_s10, %s2208_s10 }
  0x40   :  { %2064 = vmatprep.subr.bf16.mxu0 %v2063_v15 }
  0x41   :  { %p2215_p13 = por %p2214_p12, %p2213_p11 }
  0x43   :  { %2066 = vmatpush1.bf16.msra.mxu0 %v2065_v20  ;;  %p2216_p0 = pnand %p2215_p13, %p2209_p10 }
  0x44   :  { %2068 = vmatprep.subr.bf16.mxu0 %v2067_v21 }
  0x47   :  { %2070 = vmatpush1.bf16.msra.mxu0 %v2069_v24 }
  0x48   :  { %1972 = vmatprep.subr.mxu0 %v2243_v0 }
  0x4a   :  { %1864 = vmatmul.mubr.msk.f32.vlgmr.msra.gmra.mrb[0].mxu0 %vm77_vm0, %v59_v25 }
  0x4b   :  { %154 = vmatprep.mubr.f32.mxu0 %v2243_v0 }
  0x4e   :  { %1865 = vmatmul.mubr.msk.f32.gmra.mrb[2].mxu0 %vm77_vm0, %v60_v26 }
  0x4f   :  { %1974 = vmatprep.mubr.msk.f32.mxu0 %vm2244_vm1, %v2243_v0 }
 0x11d   :  { %v2331_v27 = vpop.f32.mrb[0].mxu0 }
 0x11e   :  { %177 = vrot.lane.b32.xlu0 %v2331_v27, %s2245_s2  ;;  %v2334_v28 = vpop.f32.mrb[1].mxu0 }
 0x121   :  { %v2336_v29 = vpop.f32.mrb[2].mxu0 }
 0x122   :  { %584 = vrot.lane.b32.xlu1 %v2336_v29, %s2246_s28  ;;  %255 = vrot.lane.b32.xlu0 %v2336_v29, %s2245_s2  ;;  %v2341_v30 = vpop.f32.mrb[3].mxu0 }
 0x126   :  { %582 = vrot.lane.b32.xlu1 %v2336_v29, %s2247_s29 }
 0x190   :  { %v178_v31 = vpop.permute.xlu0 %177 }
 0x191   :  { %1948 = vmatpush3.xpose.msk.msra.mxu1 %vm179_vm2, %v178_v31 }
 0x192   :  { %1952 = vmatprep.subr.mxu1 %v2243_v0 }
 0x194   :  { %1950 = vmatmul.mubr.msk.f32.vlgmr.msra.gmra.mrb[0].mxu1 %vm179_vm2, %v2331_v27  ;;  %v585_v32 = vpop.permute.xlu1 %584  ;;  %v256_v33 = vpop.permute.xlu0 %255 }
 0x195   :  { %1953 = vmatpush3.xpose.msk.msra.mxu1 %vm179_vm2, %v256_v33  ;;  %1973 = vmatpush3.xpose.msk.msra.mxu0 %vm179_vm2, %v585_v32 }
 0x196   :  { %1954 = vmatprep.mubr.msk.f32.mxu1 %vm2244_vm1, %v2243_v0  ;;  %1957 = vmatprep.subr.mxu1 %v2243_v0 }
 0x197   :  { %1982 = vmatprep.subr.mxu0 %v2243_v0 }
 0x198   :  { %v583_v34 = vpop.permute.xlu1 %582  ;;  %1955 = vmatmul.mubr.msk.f32.vlgmr.msra.gmra.mrb[2].mxu1 %vm179_vm2, %v2336_v29 }
 0x199   :  { %1958 = vmatpush3.msra.mxu1 %v2334_v28  ;;  %1975 = vmatmul.mubr.msk.f32.vlgmr.msra.gmra.mrb[4].mxu0 %vm179_vm2, %v583_v34 }
 0x19a   :  { %1959 = vmatprep.mubr.msk.f32.mxu1 %vm2244_vm1, %v2243_v0  ;;  %1962 = vmatprep.subr.mxu1 %v2243_v0 }
 0x19b   :  { %1984 = vmatprep.mubr.msk.f32.mxu0 %vm2244_vm1, %v2243_v0 }
 0x267   :  { %v250_v38 = vpop.f32.mrb[0].mxu1 }
 0x268   :  { %v331_v41 = vmul.f32 0.125, %v250_v38  ;;  %v1951_v42 = vpop.f32.mrb[1].mxu1 }
 0x26a   :  { %v333_v43 = vadd.f32 %v331_v41, %v2364_v40 }
 0x26b   :  { %v327_v44 = vpop.f32.mrb[2].mxu1 }
 0x26c   :  { %v332_v45 = vmul.f32 0.125, %v327_v44  ;;  %v1956_v46 = vpop.f32.mrb[3].mxu1  ;;  %v656_v47 = vpop.f32.mrb[4].mxu0  ;;  %v336_v48 = vsel %vm335_vm4, %v333_v43, -inf }
 0x26d   :  { %337 = vmax.xlane.f32.xlu0 %v336_v48  ;;  %v1976_v49 = vpop.f32.mrb[5].mxu0  ;;  %v661_v52 = vmul.f32 0.125, %v656_v47 }
 0x26e   :  { %v334_v50 = vadd.f32 %v332_v45, %v2364_v40 }
 0x26f   :  { %v663_v53 = vadd.f32 %v661_v52, %v2364_v40 }
 0x270   :  { %v339_v51 = vsel %vm335_vm4, %v334_v50, -inf }
 0x271   :  { %340 = vmax.xlane.f32.xlu1 %v339_v51  ;;  %v667_v54 = vsel %vm335_vm4, %v663_v53, -inf }
 0x282   :  { %506 = vrot.lane.b32.xlu1 %v2331_v27, %s2246_s28 }
 0x2a6   :  { %668 = vmax.xlane.f32.xlu1 %v667_v54 }
 0x2b7   :  { %764 = vrot.lane.b32.xlu1 %v2341_v30, %s2247_s29 }
 0x2bb   :  { %1002 = vrot.lane.b32.xlu1 %v2331_v27, %s2249_s30 }
 0x2bf   :  { %1082 = vrot.lane.b32.xlu1 %v2336_v29, %s2250_s5 }
 0x2fa   :  { %v338_v55 = vpop.xlane.xlu0 %337 }
 0x2fb   :  { %v342_v56 = vsub.f32 %v333_v43, %v338_v55 }
 0x2fd   :  { %v344_v57 = vmul.f32 1.442695, %v342_v56 }
 0x2fe   :  { %v341_v58 = vpop.xlane.xlu1 %340 }
 0x2ff   :  { %2110 = vpow2.f32 %v344_v57  ;;  %v343_v59 = vsub.f32 %v334_v50, %v341_v58 }
 0x301   :  { %v346_v60 = vmul.f32 1.442695, %v343_v59 }
 0x302   :  { %v507_v2 = vpop.permute.xlu1 %506 }
 0x303   :  { %2112 = vpow2.f32 %v346_v60 }
 0x309   :  { %v2111_v61 = vpop.eup %2110 }
 0x30a   :  { %v348_v62 = vsel %vm335_vm4, %v2111_v61, 0.0 }
 0x30b   :  { %349 = vadd.xlane.f32.xlu0 %v348_v62 }
 0x30d   :  { %v2113_v63 = vpop.eup %2112 }
 0x30e   :  { %v351_v1 = vsel %vm335_vm4, %v2113_v63, 0.0 }
 0x30f   :  { %352 = vadd.xlane.f32.xlu0 %v351_v1  ;;  %v169_v1 = vld [vmem:[#allocation7 + $0x10] sm:$0xff] }
 0x325   :  { %504 = vrot.lane.b32.xlu0 %v2331_v27, %s2247_s29 }
 0x333   :  { %v669_v3 = vpop.xlane.xlu1 %668 }
 0x334   :  { %v671_v4 = vsub.f32 %v663_v53, %v669_v3 }
 0x336   :  { %v674_v5 = vmul.f32 1.442695, %v671_v4 }
 0x337   :  { %v765_v6 = vpop.permute.xlu1 %764 }
 0x338   :  { %2114 = vpow2.f32 %v674_v5  ;;  %1983 = vmatpush3.msra.mxu0 %v765_v6 }
 0x339   :  { %2001 = vmatprep.subr.mxu0 %v2243_v0 }
 0x33b   :  { %v1003_v18 = vpop.permute.xlu1 %1002 }
 0x33f   :  { %v1083_v21 = vpop.permute.xlu1 %1082 }
 0x342   :  { %v2115_v7 = vpop.eup %2114 }
 0x343   :  { %v679_v8 = vsel %vm335_vm4, %v2115_v7, 0.0 }
 0x344   :  { %680 = vadd.xlane.f32.xlu0 %v679_v8 }
 0x35a   :  { %1004 = vrot.lane.b32.xlu0 %v2331_v27, %s2250_s5 }
 0x35e   :  { %1080 = vrot.lane.b32.xlu0 %v2336_v29, %s2249_s30 }
 0x398   :  { %v350_v9 = vpop.xlane.xlu0 %349 }
 0x399   :  { %2116 = vrcp.f32 %v350_v9 }
 0x39c   :  { %v353_v10 = vpop.xlane.xlu0 %352 }
 0x39d   :  { %2118 = vrcp.f32 %v353_v10 }
 0x3a0   :  { %v505_v15 = vpop.permute.xlu0 %504 }
 0x3a3   :  { %v2117_v11 = vpop.eup %2116 }
 0x3a4   :  { %v356_v12 = vmul.f32 %v2117_v11, %v2111_v61 }
 0x3a6   :  { %1960 = vmatmul.mubr.msk.f32.vlgmr.msra.gmra.mrb[4].mxu1 %vm335_vm4, %v356_v12 }
 0x3a7   :  { %v2119_v13 = vpop.eup %2118  ;;  %1963 = vmatpush3.msra.mxu1 %v2341_v30  ;;  %1964 = vmatprep.mubr.msk.f32.mxu1 %vm2244_vm1, %v2243_v0 }
 0x3a8   :  { %v357_v14 = vmul.f32 %v2119_v13, %v2113_v63  ;;  %1967 = vmatprep.subr.mxu1 %v2243_v0 }
 0x3aa   :  { %1965 = vmatmul.mubr.msk.f32.vlgmr.msra.gmra.mrb[6].mxu1 %vm335_vm4, %v357_v14  ;;  %v167_v14 = vld [vmem:[#allocation7] sm:$0xff] }
 0x3ab   :  { %1969 = vmatprep.mubr.msk.f32.mxu1 %vm2244_vm1, %v2243_v0 }
 0x3ae   :  { %1968 = vmatpush3.xpose.msk.msra.mxu1 %vm179_vm2, %v507_v2  ;;  %v170_v2 = vld [vmem:[#allocation7 + $0x18] sm:$0xff] }
 0x3af   :  { %1977 = vmatprep.subr.mxu1 %v2243_v0  ;;  %v2071_v3 = vpack.c.bf16 %v170_v2, %v169_v1 }
 0x3b1   :  { %1970 = vmatmul.mubr.msk.f32.vlgmr.msra.gmra.mrb[8].mxu1 %vm179_vm2, %v505_v15  ;;  %v168_v15 = vld [vmem:[#allocation7 + $0x8] sm:$0xff] }
 0x3b2   :  { %1979 = vmatprep.mubr.msk.f32.mxu1 %vm2244_vm1, %v2243_v0 }
 0x3d1   :  { %v681_v16 = vpop.xlane.xlu0 %680 }
 0x3d2   :  { %2120 = vrcp.f32 %v681_v16  ;;  %v2075_v16 = vpack.c.bf16 %v168_v15, %v167_v14 }
 0x3d5   :  { %v1005_v20 = vpop.permute.xlu0 %1004 }
 0x3d9   :  { %v1081_v22 = vpop.permute.xlu0 %1080 }
 0x3dc   :  { %v2121_v17 = vpop.eup %2120 }
 0x3dd   :  { %v685_v19 = vmul.f32 %v2121_v17, %v2115_v7 }
 0x3df   :  { %1985 = vmatmul.mubr.msk.f32.vlgmr.msra.gmra.mrb[6].mxu0 %vm335_vm4, %v685_v19 }
 0x3e0   :  { %2002 = vmatpush3.xpose.msk.msra.mxu0 %vm179_vm2, %v1005_v20  ;;  %2003 = vmatprep.mubr.msk.f32.mxu0 %vm2244_vm1, %v2243_v0 }
 0x3e1   :  { %2006 = vmatprep.subr.mxu0 %v2243_v0 }
 0x3e3   :  { %2004 = vmatmul.mubr.msk.f32.vlgmr.msra.gmra.mrb[8].mxu0 %vm179_vm2, %v1003_v18 }
 0x3e4   :  { %2007 = vmatpush3.xpose.msk.msra.mxu0 %vm179_vm2, %v1083_v21  ;;  %2008 = vmatprep.mubr.msk.f32.mxu0 %vm2244_vm1, %v2243_v0 }
 0x3e5   :  { %2016 = vmatprep.subr.mxu0 %v2243_v0 }
 0x3e7   :  { %2009 = vmatmul.mubr.msk.f32.vlgmr.msra.gmra.mrb[10].mxu0 %vm179_vm2, %v1081_v22 }
 0x3e8   :  { %2018 = vmatprep.mubr.msk.f32.mxu0 %vm2244_vm1, %v2243_v0 }
 0x479   :  { %v2414_v23 = vpop.f32.mrb[4].mxu1 }
 0x47a   :  { %v1961_v24 = vpop.f32.mrb[5].mxu1 }
 0x47d   :  { %v2416_v25 = vpop.f32.mrb[6].mxu1 }
 0x47e   :  { %v1966_v26 = vpop.f32.mrb[7].mxu1 }
 0x484   :  { %v578_v31 = vpop.f32.mrb[8].mxu1 }
 0x485   :  { %v660_v32 = vmul.f32 0.125, %v578_v31  ;;  %v1971_v33 = vpop.f32.mrb[9].mxu1 }
 0x487   :  { %v662_v34 = vadd.f32 %v660_v32, %v2364_v40 }
 0x489   :  { %v664_v35 = vsel %vm335_vm4, %v662_v34, -inf }
 0x48a   :  { %665 = vmax.xlane.f32.xlu1 %v664_v35  ;;  %v172_v35 = vld [vmem:[#allocation7 + $0x28] sm:$0xff] }
 0x4b2   :  { %v2420_v36 = vpop.f32.mrb[6].mxu0 }
 0x4b3   :  { %v1986_v37 = vpop.f32.mrb[7].mxu0 }
 0x4b6   :  { %v1076_v38 = vpop.f32.mrb[8].mxu0 }
 0x4b7   :  { %v1158_v39 = vmul.f32 0.125, %v1076_v38  ;;  %v2005_v41 = vpop.f32.mrb[9].mxu0 }
 0x4b9   :  { %v1160_v42 = vadd.f32 %v1158_v39, %v2364_v40 }
 0x4ba   :  { %v1154_v43 = vpop.f32.mrb[10].mxu0 }
 0x4bb   :  { %v1159_v44 = vmul.f32 0.125, %v1154_v43  ;;  %v2010_v45 = vpop.f32.mrb[11].mxu0  ;;  %v1162_v46 = vsel %vm335_vm4, %v1160_v42, -inf }
 0x4bc   :  { %1163 = vmax.xlane.f32.xlu1 %v1162_v46 }
 0x4bd   :  { %v1161_v47 = vadd.f32 %v1159_v44, %v2364_v40 }
 0x4bf   :  { %v1165_v48 = vsel %vm335_vm4, %v1161_v47, -inf }
 0x4c0   :  { %1166 = vmax.xlane.f32.xlu1 %v1165_v48 }
 0x517   :  { %v666_v49 = vpop.xlane.xlu1 %665 }
 0x518   :  { %v670_v50 = vsub.f32 %v662_v34, %v666_v49  ;;  %v171_v34 = vld [vmem:[#allocation7 + $0x20] sm:$0xff] }
 0x51a   :  { %v672_v51 = vmul.f32 1.442695, %v670_v50 }
 0x51c   :  { %2122 = vpow2.f32 %v672_v51 }
 0x526   :  { %v2123_v52 = vpop.eup %2122 }
 0x527   :  { %v676_v53 = vsel %vm335_vm4, %v2123_v52, 0.0 }
 0x528   :  { %677 = vadd.xlane.f32.xlu0 %v676_v53 }
 0x53e   :  { %687 = vrot.lane.b32.xlu0 %v2334_v28, %s2247_s29 }
 0x542   :  { %1260 = vrot.lane.b32.xlu0 %v2341_v30, %s2249_s30 }
 0x546   :  { %1421 = vrot.lane.b32.xlu0 %v2331_v27, %s2238_s26 }
 0x549   :  { %v1164_v54 = vpop.xlane.xlu1 %1163 }
 0x54a   :  { %1499 = vrot.lane.b32.xlu0 %v2336_v29, %s2238_s26  ;;  %v1168_v55 = vsub.f32 %v1160_v42, %v1164_v54 }
 0x54c   :  { %v1170_v56 = vmul.f32 1.442695, %v1168_v55 }
 0x54d   :  { %v1167_v57 = vpop.xlane.xlu1 %1166 }
 0x54e   :  { %2124 = vpow2.f32 %v1170_v56  ;;  %1419 = vrot.lane.b32.xlu0 %v2331_v27, %s2251_s6  ;;  %v1169_v58 = vsub.f32 %v1161_v47, %v1167_v57  ;;  %v174_v57 = vld [vmem:[#allocation7 + $0x38] sm:$0xff] }
 0x550   :  { %v1172_v59 = vmul.f32 1.442695, %v1169_v58 }
 0x552   :  { %2126 = vpow2.f32 %v1172_v59 }
 0x558   :  { %v2125_v60 = vpop.eup %2124 }
 0x559   :  { %v1174_v61 = vsel %vm335_vm4, %v2125_v60, 0.0 }
 0x55a   :  { %1175 = vadd.xlane.f32.xlu1 %v1174_v61 }
 0x55c   :  { %v2127_v62 = vpop.eup %2126 }
 0x55d   :  { %v1177_v63 = vsel %vm335_vm4, %v2127_v62, 0.0 }
 0x55e   :  { %1178 = vadd.xlane.f32.xlu1 %v1177_v63 }
 0x56f   :  { %1184 = vrot.lane.b32.xlu1 %v2334_v28, %s2249_s30 }
 0x573   :  { %1497 = vrot.lane.b32.xlu1 %v2336_v29, %s2251_s6 }
 0x5b5   :  { %v678_v27 = vpop.xlane.xlu0 %677 }
 0x5b6   :  { %2128 = vrcp.f32 %v678_v27 }
 0x5b9   :  { %v688_v4 = vpop.permute.xlu0 %687 }
 0x5ba   :  { %1978 = vmatpush3.msra.mxu1 %v688_v4 }
 0x5bb   :  { %2072 = vmatprep.subr.bf16.mxu1 %v2071_v3 }
 0x5bd   :  { %v1261_v5 = vpop.permute.xlu0 %1260 }
 0x5be   :  { %2017 = vmatpush3.msra.mxu0 %v1261_v5 }
 0x5bf   :  { %2028 = vmatprep.subr.mxu0 %v2243_v0 }
 0x5c0   :  { %v2129_v6 = vpop.eup %2128 }
 0x5c1   :  { %v684_v7 = vmul.f32 %v2129_v6, %v2123_v52  ;;  %v1422_v29 = vpop.permute.xlu0 %1421 }
 0x5c3   :  { %1980 = vmatmul.mubr.msk.f32.vlgmr.msra.gmra.mrb[10].mxu1 %vm335_vm4, %v684_v7 }
 0x5c4   :  { %2074 = vmatpush3.bf16.msra.mxu1 %v2071_v3 }
 0x5c5   :  { %v1500_v11 = vpop.permute.xlu0 %1499  ;;  %2076 = vmatprep.subr.bf16.mxu1 %v2075_v16 }
 0x5c9   :  { %v1420_v13 = vpop.permute.xlu0 %1419 }
 0x5e7   :  { %v1176_v8 = vpop.xlane.xlu1 %1175 }
 0x5eb   :  { %v1179_v9 = vpop.xlane.xlu1 %1178 }
 0x5ec   :  { %2130 = vrcp.f32 %v1179_v9 }
 0x5ed   :  { %2132 = vrcp.f32 %v1176_v8 }
 0x5ef   :  { %v1185_v20 = vpop.permute.xlu1 %1184 }
 0x5f3   :  { %v1498_v44 = vpop.permute.xlu1 %1497 }
 0x5f6   :  { %v2131_v10 = vpop.eup %2130 }
 0x5f7   :  { %v1183_v12 = vmul.f32 %v2131_v10, %v2127_v62  ;;  %v2133_v19 = vpop.eup %2132 }
 0x5f8   :  { %v1182_v21 = vmul.f32 %v2133_v19, %v2125_v60 }
 0x5f9   :  { %2019 = vmatmul.mubr.msk.f32.vlgmr.msra.gmra.mrb[12].mxu0 %vm335_vm4, %v1183_v12 }
 0x5fa   :  { %2029 = vmatpush3.xpose.msk.msra.mxu0 %vm179_vm2, %v1422_v29  ;;  %2030 = vmatprep.mubr.msk.f32.mxu0 %vm2244_vm1, %v2243_v0 }
 0x5fb   :  { %2038 = vmatprep.subr.mxu0 %v2243_v0 }
 0x5fd   :  { %2031 = vmatmul.mubr.msk.f32.vlgmr.msra.gmra.mrb[14].mxu0 %vm179_vm2, %v1420_v13 }
 0x5fe   :  { %2040 = vmatprep.mubr.msk.f32.mxu0 %vm2244_vm1, %v2243_v0 }
 0x696   :  { %v759_v17 = vpop.f32.mrb[10].mxu1 }
 0x697   :  { %v1981_v18 = vpop.f32.mrb[11].mxu1  ;;  %1991 = vmatprep.mubr.msk.f32.mxu1 %vm179_vm2, %v759_v17 }
 0x698   :  { %1992 = vmatmul.mubr.msk.f32.vlgmr.msra.gmra.mrb[12].mxu1 %vm179_vm2, %v2420_v36 }
 0x699   :  { %2078 = vmatpush3.bf16.msra.mxu1 %v2075_v16  ;;  %1998 = vmatprep.mubr.msk.f32.mxu1 %vm179_vm2, %v2414_v23 }
 0x69a   :  { %2011 = vmatprep.subr.mxu1 %v2243_v0 }
 0x6a0   :  { %1999 = vmatmul.mubr.msk.f32.vlgmr.msra.gmra.mrb[12].mxu1 %vm179_vm2, %v2416_v25  ;;  %v2079_v25 = vpack.c.bf16 %v172_v35, %v171_v34 }
 0x6a1   :  { %2012 = vmatpush3.msra.mxu1 %v1185_v20  ;;  %2013 = vmatprep.mubr.msk.f32.mxu1 %vm2244_vm1, %v2243_v0 }
 0x6a2   :  { %2080 = vmatprep.subr.bf16.mxu1 %v2079_v25 }
 0x6a4   :  { %2014 = vmatmul.mubr.msk.f32.vlgmr.msra.gmra.mrb[14].mxu1 %vm335_vm4, %v1182_v21 }
 0x6a5   :  { %2082 = vmatpush3.bf16.msra.mxu1 %v2079_v25 }
 0x6a6   :  { %2033 = vmatprep.subr.mxu1 %v2243_v0 }
 0x6cc   :  { %v1332_v22 = vpop.f32.mrb[12].mxu0 }
 0x6cd   :  { %v2020_v24 = vpop.f32.mrb[13].mxu0 }
 0x6d0   :  { %v1493_v26 = vpop.f32.mrb[14].mxu0 }
 0x6d1   :  { %v1575_v31 = vmul.f32 0.125, %v1493_v26  ;;  %v2032_v32 = vpop.f32.mrb[15].mxu0 }
 0x6d3   :  { %v1577_v23 = vadd.f32 %v1575_v31, %v2364_v40 }
 0x6d5   :  { %v1579_v33 = vsel %vm335_vm4, %v1577_v23, -inf }
 0x6d6   :  { %1580 = vmax.xlane.f32.xlu0 %v1579_v33 }
 0x763   :  { %v1581_v36 = vpop.xlane.xlu0 %1580 }
 0x764   :  { %v1585_v37 = vsub.f32 %v1577_v23, %v1581_v36 }
 0x766   :  { %v1587_v38 = vmul.f32 1.442695, %v1585_v37 }
 0x768   :  { %2134 = vpow2.f32 %v1587_v38 }
 0x772   :  { %v2135_v39 = vpop.eup %2134 }
 0x773   :  { %v1591_v41 = vsel %vm335_vm4, %v2135_v39, 0.0 }
 0x774   :  { %1592 = vadd.xlane.f32.xlu0 %v1591_v41 }
 0x777   :  { %v1256_v42 = vpop.f32.mrb[14].mxu1 }
 0x778   :  { %v2015_v43 = vpop.f32.mrb[15].mxu1  ;;  %2025 = vmatprep.mubr.msk.f32.mxu1 %vm179_vm2, %v1256_v42 }
 0x779   :  { %2026 = vmatmul.mubr.msk.f32.vlgmr.msra.gmra.mrb[12].mxu1 %vm179_vm2, %v1332_v22 }
 0x77a   :  { %2034 = vmatpush3.xpose.msk.msra.mxu1 %vm179_vm2, %v1500_v11  ;;  %2035 = vmatprep.mubr.msk.f32.mxu1 %vm2244_vm1, %v2243_v0 }
 0x77b   :  { %2043 = vmatprep.subr.mxu1 %v2243_v0 }
 0x77d   :  { %2036 = vmatmul.mubr.msk.f32.vlgmr.msra.gmra.mrb[16].mxu1 %vm179_vm2, %v1498_v44 }
 0x77e   :  { %2045 = vmatprep.mubr.msk.f32.mxu1 %vm2244_vm1, %v2243_v0 }
 0x801   :  { %v1593_v50 = vpop.xlane.xlu0 %1592 }
 0x802   :  { %2136 = vrcp.f32 %v1593_v50 }
 0x80c   :  { %v2137_v52 = vpop.eup %2136 }
 0x80d   :  { %v1599_v55 = vmul.f32 %v2137_v52, %v2135_v39 }
 0x850   :  { %v1571_v45 = vpop.f32.mrb[16].mxu1 }
 0x851   :  { %v1576_v46 = vmul.f32 0.125, %v1571_v45  ;;  %v2037_v47 = vpop.f32.mrb[17].mxu1 }
 0x853   :  { %v1578_v48 = vadd.f32 %v1576_v46, %v2364_v40 }
 0x855   :  { %v1582_v49 = vsel %vm335_vm4, %v1578_v48, -inf }
 0x856   :  { %1583 = vmax.xlane.f32.xlu1 %v1582_v49 }
 0x867   :  { %1601 = vrot.lane.b32.xlu1 %v2334_v28, %s2251_s6  ;;  %v173_v28 = vld [vmem:[#allocation7 + $0x30] sm:$0xff] }
 0x868   :  { %v2083_v59 = vpack.c.bf16 %v174_v57, %v173_v28 }
 0x8e3   :  { %v1584_v51 = vpop.xlane.xlu1 %1583 }
 0x8e4   :  { %v1586_v53 = vsub.f32 %v1578_v48, %v1584_v51 }
 0x8e6   :  { %v1589_v54 = vmul.f32 1.442695, %v1586_v53 }
 0x8e7   :  { %v1602_v56 = vpop.permute.xlu1 %1601 }
 0x8e8   :  { %2138 = vpow2.f32 %v1589_v54  ;;  %2039 = vmatpush3.msra.mxu0 %v1602_v56 }
 0x8e9   :  { %2041 = vmatmul.mubr.msk.f32.vlgmr.msra.gmra.mrb[16].mxu0 %vm335_vm4, %v1599_v55 }
 0x8f2   :  { %v2139_v0 = vpop.eup %2138 }
 0x8f3   :  { %v1594_v40 = vsel %vm335_vm4, %v2139_v0, 0.0 }
 0x8f4   :  { %1595 = vadd.xlane.f32.xlu0 %v1594_v40 }
 0x90a   :  { %1677 = vrot.lane.b32.xlu0 %v2341_v30, %s2251_s6  ;;  %v1898_v30 = vld [vmem:[%s2511_s3] ss:$0 sm:$0xff] }
 0x981   :  { %v1596_v58 = vpop.xlane.xlu0 %1595 }
 0x982   :  { %2140 = vrcp.f32 %v1596_v58 }
 0x985   :  { %v1678_v60 = vpop.permute.xlu0 %1677 }
 0x986   :  { %2044 = vmatpush3.msra.mxu1 %v1678_v60 }
 0x987   :  { %2084 = vmatprep.subr.bf16.mxu1 %v2083_v59 }
 0x98c   :  { %v2141_v61 = vpop.eup %2140 }
 0x98d   :  { %v1600_v62 = vmul.f32 %v2141_v61, %v2139_v0 }
 0x98f   :  { %2046 = vmatmul.mubr.msk.f32.vlgmr.msra.gmra.mrb[18].mxu1 %vm335_vm4, %v1600_v62 }
 0x990   :  { %2086 = vmatpush3.bf16.msra.mxu1 %v2083_v59 }
 0x9bc   :  { %v1673_v63 = vpop.f32.mrb[16].mxu0 }
 0x9bd   :  { %v2042_v1 = vpop.f32.mrb[17].mxu0  ;;  %2052 = vmatprep.mubr.msk.f32.mxu1 %vm179_vm2, %v1673_v63 }
 0xa62   :  { %v1749_v2 = vpop.f32.mrb[18].mxu1 }
 0xa63   :  { %v2047_v27 = vpop.f32.mrb[19].mxu1  ;;  %2053 = vmatmul.mubr.msk.f32.vlgmr.msra.gmra.mrb[12].mxu1 %vm179_vm2, %v1749_v2 }
 0xb36   :  { %v2054_v3 = vpop.f32.mrb[12].mxu1 }
 0xb37   :  { %v1843_v4 = vadd.f32 %v2054_v3, %v1898_v30  ;;  %v1825_v5 = vpop.f32.mrb[13].mxu1 }
 0xb38   :  { %v1842_v6 = vadd.f32 %v1898_v30, %v1825_v5 }
 0xb39   :  { %1845 = vst.msk [vmem:[#allocation8 + $0x8] sm:$0xff] %vm77_vm0, %v1843_v4 }
 0xb3a   :  { %1844 = vst.msk [vmem:[#allocation8] sm:$0xff] %vm77_vm0, %v1842_v6 }
 0xb3b   :  { %2219 = shalt.err (!%p2216_p0)
}
 0xb3c   :  { %s2220_s12 = scalar_lea.hbm %s2512_s4, 256 }
 0xb3d   :  { %p2221_p1 = scmp.ne.s32.totalorder %s2512_s4, %s2220_s12  ;;  %p2224_p2 = scmp.lt.u32.totalorder %s2220_s12, %s2512_s4 }
 0xb3f   :  { %p2226_p3 = pnand %p2224_p2, %p2221_p1 }
 0xb41   :  { %2229 = shalt.err (!%p2226_p3)
}
 0xb42   :  { %1857 = dma.vmem_to_hbm [thread:$0]  %s1852_s9, 256, %s2512_s4, [#allocation4], %s2240_s1, %s2240_s1, %s2241_s13  }
 0xb43   :  { %2234 = dma.done.wait [#allocation4], 256  }
 0xb44   :  { %2235 = vsyncadd [#allocation4], 4294967040 }
 0xb45   :  { %1861 = vsyncpa [#allocation3], 1 }
 0xb46   :  { %1862 = vsyncpa [#allocation6], 1 }
 0xb47   :  { %1863 = vsyncpa [#allocation4], 1 }

</bundles_post_ra>
